<compile_context>
chip_gen: v6e
topology: v6e:2x2x1
jax: 0.10.0
libtpu: 0.0.40
codegen_flags: <defaults>
</compile_context>

<pallas_src>
import numpy as np
import jax
import jax.numpy as jnp
from jax.experimental import pallas as pl
from jax.experimental.pallas import tpu as pltpu


# ----------------------------------------------------------------------------
# Mode selection (same semantics as the PyTorch helper, made deterministic
# by seeding numpy before the shuffle).
# ----------------------------------------------------------------------------
def get_frequency_modes(seq_len, modes=64, mode_select_method="random"):
    modes = min(modes, seq_len // 2)
    if mode_select_method == "random":
        index = list(range(0, seq_len // 2))
        np.random.shuffle(index)
        index = index[:modes]
    else:
        index = list(range(0, modes))
    index.sort()
    return index


# ----------------------------------------------------------------------------
# Pallas kernel: per head, batched-over-modes complex matmul.
#   x_ref: (M, 2b, d_in)    rows [0:b] = Re(X), rows [b:2b] = Im(X)
#   w_ref: (M, d_in, 2*d)   cols [0:d] = Re(W), cols [d:2d] = Im(W)
#   y_ref: (M, b, 2*d)      cols [0:d] = Re(Y), cols [d:2d] = Im(Y)
# One MXU contraction per mode gives [rr | ri; ir | ii]; VPU combines them.
# ----------------------------------------------------------------------------
def _compl_mul_kernel(x_ref, w_ref, y_ref):
    x = x_ref[...]                      # (M, 2b, d_in)
    w = w_ref[...]                      # (M, d_in, 2*d_out)
    prod = jnp.einsum("mri,mio->mro", x, w,
                      preferred_element_type=jnp.float32)   # (M, 2b, 2*d_out)

    b = y_ref.shape[1]
    d_out = y_ref.shape[2] // 2

    rr = prod[:, :b, :d_out]            # Re(X) @ Re(W)
    ri = prod[:, :b, d_out:]            # Re(X) @ Im(W)
    ir = prod[:, b:, :d_out]            # Im(X) @ Re(W)
    ii = prod[:, b:, d_out:]            # Im(X) @ Im(W)

    yr = rr - ii
    yi = ri + ir
    y_ref[...] = jnp.concatenate([yr, yi], axis=-1)   # single lane-dense store


def compl_mul_pallas(x_stacked, w_cat):
    """x_stacked: (h, M, 2b, d_in), w_cat: (h, M, d_in, 2*d_out)
       -> (h, M, b, 2*d_out) with real||imag concatenated on the last dim."""
    h, M, twob, d_in = x_stacked.shape
    d_out2 = w_cat.shape[-1]
    b = twob // 2

    x_spec = pl.BlockSpec((None, M, twob, d_in), lambda i: (i, 0, 0, 0))
    w_spec = pl.BlockSpec((None, M, d_in, d_out2), lambda i: (i, 0, 0, 0))
    y_spec = pl.BlockSpec((None, M, b, d_out2), lambda i: (i, 0, 0, 0))

    out_shape = jax.ShapeDtypeStruct((h, M, b, d_out2), jnp.float32)
    return pl.pallas_call(
        _compl_mul_kernel,
        grid=(h,),
        in_specs=[x_spec, w_spec],
        out_specs=y_spec,
        out_shape=out_shape,
        compiler_params=pltpu.CompilerParams(
            dimension_semantics=("parallel",),
            vmem_limit_bytes=48 * 1024 * 1024,   # safe on v7x (64 MiB VMEM)
        ),
    )(x_stacked, w_cat)


# ----------------------------------------------------------------------------
# Full FEB-f forward (FFT / iFFT are JAX glue; no Pallas FFT primitive exists).
# ----------------------------------------------------------------------------
def febf_forward(x, weights_r, weights_i, index):
    """x: (b, t, h, d) float32; weights_*: (h, d, d, M) float32."""
    b, t, h, d = x.shape
    M = len(index)

    xp = jnp.transpose(x, (0, 2, 3, 1))                 # (b, h, d, t)
    # TODO(synk): FFT has no Pallas equivalent; rfft/irfft stay in JAX glue.
    x_ft = jnp.fft.rfft(xp, axis=-1)                    # (b, h, d, t//2+1)

    idx = jnp.asarray(index, dtype=jnp.int32)
    xm = jnp.take(x_ft, idx, axis=-1)                   # (b, h, d, M)
    xm = jnp.transpose(xm, (1, 3, 0, 2))                # (h, M, b, d)
    xr = jnp.real(xm).astype(jnp.float32)
    xi = jnp.imag(xm).astype(jnp.float32)
    # Stack real/imag along the row (sublane) dim -> (h, M, 2b, d).
    x_stacked = jnp.concatenate([xr, xi], axis=2)

    wr = jnp.transpose(weights_r, (0, 3, 1, 2))         # (h, M, d_in, d_out)
    wi = jnp.transpose(weights_i, (0, 3, 1, 2))
    # Concatenate real/imag weights along the lane dim -> (h, M, d_in, 2*d_out).
    w_cat = jnp.concatenate([wr, wi], axis=-1)

    # TODO(synk): the mode gather / transposes could be folded into the
    # pallas_call via PrefetchScalarGridSpec + Element block dims; kept in
    # the XLA wrapper here for simplicity.
    y = compl_mul_pallas(x_stacked, w_cat)              # (h, M, b, 2*d)
    yr = y[..., :d]
    yi = y[..., d:]

    y_c = (yr + 1j * yi).astype(jnp.complex64)          # (h, M, b, d)
    y_c = jnp.transpose(y_c, (2, 0, 3, 1))              # (b, h, d, M)

    F = t // 2 + 1
    out_ft = jnp.zeros((b, h, d, F), dtype=jnp.complex64)
    # torch code writes result for mode index[wi] into frequency slot wi.
    out_ft = out_ft.at[..., :M].set(y_c)

    x_out = jnp.fft.irfft(out_ft, n=t, axis=-1)         # (b, h, d, t) real
    return jnp.transpose(x_out, (0, 3, 1, 2)).astype(jnp.float32)  # (b, t, h, d)


# ----------------------------------------------------------------------------
# Pure-JAX reference mirroring the PyTorch forward literally.
# ----------------------------------------------------------------------------
def febf_reference(x, weights_r, weights_i, index):
    b, t, h, d = x.shape
    xp = jnp.transpose(x, (0, 2, 3, 1))
    x_ft = jnp.fft.rfft(xp, axis=-1)
    W = (weights_r + 1j * weights_i).astype(jnp.complex64)   # (h, d, d, M)
    out_ft = jnp.zeros((b, h, d, t // 2 + 1), dtype=jnp.complex64)
    for slot, freq in enumerate(index):
        val = jnp.einsum("bhi,hio->bho", x_ft[:, :, :, freq], W[:, :, :, slot])
        out_ft = out_ft.at[:, :, :, slot].set(val)
    x_out = jnp.fft.irfft(out_ft, n=t, axis=-1)
    return jnp.transpose(x_out, (0, 3, 1, 2)).astype(jnp.float32)


if __name__ == "__main__":
    # Small deterministic config consistent with the module:
    #   d_model=32, num_heads=4 -> per-head dim d = 8, seq_len=16, batch=2
    batch, seq_len, d_model, num_heads, num_modes = 2, 16, 32, 4, 4
    d_head = d_model // num_heads

    np.random.seed(0)  # deterministic 'random' mode selection
    index = get_frequency_modes(seq_len, modes=num_modes,
                                mode_select_method="random")
    M = len(index)

    key = jax.random.PRNGKey(0)
    kx, kwr, kwi = jax.random.split(key, 3)

    x = jax.random.normal(kx, (batch, seq_len, num_heads, d_head),
                          dtype=jnp.float32)

    # weights1 = scale * torch.rand(h, d, d, M, cfloat): uniform real & imag.
    scale = 1.0 / (d_model * d_model)
    weights_r = scale * jax.random.uniform(kwr, (num_heads, d_head, d_head, M),
                                           dtype=jnp.float32)
    weights_i = scale * jax.random.uniform(kwi, (num_heads, d_head, d_head, M),
                                           dtype=jnp.float32)

    out = febf_forward(x, weights_r, weights_i, index)
    out = jax.block_until_ready(out)

    ref = jax.block_until_ready(febf_reference(x, weights_r, weights_i, index))

    assert out.shape == (batch, seq_len, num_heads, d_head), out.shape
    np.testing.assert_allclose(np.asarray(out), np.asarray(ref),
                               rtol=1e-4, atol=1e-5)
    print("KERNEL_OK")
</pallas_src>

<mosaic_0001>
module attributes {stable_mosaic.version = 11 : i64} {
  func.func @_compl_mul_kernel(%arg0: i32, %arg1: memref<1x4x4x8xf32, #tpu.memory_space<vmem>>, %arg2: memref<1x4x8x16xf32, #tpu.memory_space<vmem>>, %arg3: memref<1x4x2x16xf32, #tpu.memory_space<vmem>>) attributes {dimension_semantics = [#tpu.dimension_semantics<parallel>], iteration_bounds = array<i64: 4>, scalar_prefetch = 0 : i64, scratch_operands = 0 : i64, tpu.core_type = #tpu.core_type<tc>, window_params = [{transform_indices = @transform_0, window_bounds = array<i64: 1, 4, 4, 8>}, {transform_indices = @transform_1, window_bounds = array<i64: 1, 4, 8, 16>}, {transform_indices = @transform_2, window_bounds = array<i64: 1, 4, 2, 16>}]} {
    %c0 = arith.constant 0 : index
    %c0_0 = arith.constant 0 : index
    %c0_1 = arith.constant 0 : index
    %c0_2 = arith.constant 0 : index
    %0 = vector.load %arg1[%c0, %c0_0, %c0_1, %c0_2] : memref<1x4x4x8xf32, #tpu.memory_space<vmem>>, vector<1x4x4x8xf32>
    %1 = vector.shape_cast %0 : vector<1x4x4x8xf32> to vector<4x4x8xf32>
    %c0_3 = arith.constant 0 : index
    %c0_4 = arith.constant 0 : index
    %c0_5 = arith.constant 0 : index
    %c0_6 = arith.constant 0 : index
    %2 = vector.load %arg2[%c0_3, %c0_4, %c0_5, %c0_6] : memref<1x4x8x16xf32, #tpu.memory_space<vmem>>, vector<1x4x8x16xf32>
    %3 = vector.shape_cast %2 : vector<1x4x8x16xf32> to vector<4x8x16xf32>
    "tpu.trace_start"() <{level = 10 : i32, message = "mri,mio->mro"}> : () -> ()
    %cst = arith.constant dense<0.000000e+00> : vector<4x4x16xf32>
    %4 = tpu.matmul %1, %3, %cst {dimension_numbers = #tpu.dot_dimension_numbers<[2], [1], [1], [2], [0, 0, 0, 1, 1, 2], [0], [0]>} : vector<4x4x8xf32>, vector<4x8x16xf32>, vector<4x4x16xf32> -> vector<4x4x16xf32>
    "tpu.trace_stop"() : () -> ()
    %5 = vector.extract_strided_slice %4 {offsets = [0, 0, 0], sizes = [4, 2, 8], strides = [1, 1, 1]} : vector<4x4x16xf32> to vector<4x2x8xf32>
    %6 = vector.extract_strided_slice %4 {offsets = [0, 0, 8], sizes = [4, 2, 8], strides = [1, 1, 1]} : vector<4x4x16xf32> to vector<4x2x8xf32>
    %7 = vector.extract_strided_slice %4 {offsets = [0, 2, 0], sizes = [4, 2, 8], strides = [1, 1, 1]} : vector<4x4x16xf32> to vector<4x2x8xf32>
    %8 = vector.extract_strided_slice %4 {offsets = [0, 2, 8], sizes = [4, 2, 8], strides = [1, 1, 1]} : vector<4x4x16xf32> to vector<4x2x8xf32>
    %9 = arith.subf %5, %8 : vector<4x2x8xf32>
    %10 = arith.addf %6, %7 : vector<4x2x8xf32>
    %11 = tpu.concatenate %9, %10 in 2 : vector<4x2x8xf32>, vector<4x2x8xf32> -> vector<4x2x16xf32>
    %c0_7 = arith.constant 0 : index
    %c0_8 = arith.constant 0 : index
    %c0_9 = arith.constant 0 : index
    %c0_10 = arith.constant 0 : index
    %12 = vector.load %arg3[%c0_7, %c0_8, %c0_9, %c0_10] : memref<1x4x2x16xf32, #tpu.memory_space<vmem>>, vector<1x4x2x16xf32>
    %13 = vector.shape_cast %12 : vector<1x4x2x16xf32> to vector<4x2x16xf32>
    %14 = vector.shape_cast %11 : vector<4x2x16xf32> to vector<1x4x2x16xf32>
    tpu.vector_store %arg3[%c0_7, %c0_8, %c0_9, %c0_10], %14 {strides = array<i32>} : memref<1x4x2x16xf32, #tpu.memory_space<vmem>>, vector<1x4x2x16xf32>,
    return
  }
  func.func @transform_0(%arg0: i32) -> (i32, i32, i32, i32) {
    %c0_i32 = arith.constant 0 : i32
    %c0_i32_0 = arith.constant 0 : i32
    %c0_i32_1 = arith.constant 0 : i32
    %c0_i32_2 = arith.constant 0 : i32
    return %arg0, %c0_i32, %c0_i32_0, %c0_i32_1 : i32, i32, i32, i32
  }
  func.func @transform_1(%arg0: i32) -> (i32, i32, i32, i32) {
    %c0_i32 = arith.constant 0 : i32
    %c0_i32_0 = arith.constant 0 : i32
    %c0_i32_1 = arith.constant 0 : i32
    %c0_i32_2 = arith.constant 0 : i32
    return %arg0, %c0_i32, %c0_i32_0, %c0_i32_1 : i32, i32, i32, i32
  }
  func.func @transform_2(%arg0: i32) -> (i32, i32, i32, i32) {
    %c0_i32 = arith.constant 0 : i32
    %c0_i32_0 = arith.constant 0 : i32
    %c0_i32_1 = arith.constant 0 : i32
    %c0_i32_2 = arith.constant 0 : i32
    return %arg0, %c0_i32, %c0_i32_0, %c0_i32_1 : i32, i32, i32, i32
  }
}

</mosaic_0001>

<bundles_post_ra>
// kernel: tpu_custom_call.1
= control target key start
LH: loop header
LB: loop body
LE: loop exit
PB: predicated region body
PF: predicated region fallthrough
CT: control target
= control target key end

     0   :  { %7 = vsyncpa [#allocation3], 0  ;;  %s1154_s0 = inlined_call_operand.hbm [shape: f32[4,4,4,8], index: 0, kind: input, shape index: {}]   ;;  %s1155_s1 = inlined_call_operand.hbm [shape: f32[4,4,8,16], index: 1, kind: input, shape index: {}]   ;;  %s1156_s2 = inlined_call_operand.hbm [shape: f32[4,4,2,16], index: 2, kind: output, shape index: {}]  }
   0x1   :  { %9 = vsyncpa [#allocation3 + $0x1], 0 }
   0x2   :  { %10 = vsyncpa [#allocation6], 0 }
   0x3   :  { %12 = vsyncpa [#allocation6 + $0x1], 0 }
   0x4   :  { %13 = vsyncpa [#allocation4], 0 }
   0x5   :  { %15 = vsyncpa [#allocation4 + $0x1], 0  ;;  %s930_s9 = smov 0   ;;  %s932_s10 = smov 0  }
   0x6   :  { %s934_s11 = smov 0   ;;  %s936_s12 = smov 0  }
   0x7 LB: > { %s951_s13 = sadd.s32 4294967295, %s900_s12   ;;  %s662_s14 = sadd.s32 4294967294, %s900_s12   ;;  %s900_s12 = sphi %s936_s12, %s1171_s12   ;;  %s896_s11 = sphi %s934_s11, %s1170_s11   ;;  %s892_s10 = sphi %s932_s10, %s1169_s10   ;;  %s888_s9 = sphi %s930_s9, %s1168_s9  }
   0x8   : > { %s955_s15 = sadd.s32 1, %s900_s12   ;;  %s28_s16 = sadd.s32 1, %s896_s11 }
   0x9   : > { %s25_s17 = ssub.s32 %s900_s12, %s955_s15  ;;  %p35_p0 = scmp.ne.s32.totalorder %s896_s11, %s892_s10 }
   0xa   : > { %p26_p1 = scmp.eq.s32.totalorder %s25_s17, 0  ;;  %p36_p2 = scmp.eq.s32.totalorder %s900_s12, 0 }
   0xb   : > { %p41_p3 = scmp.ne.s32.totalorder %s892_s10, %s888_s9  ;;  %p42_p4 = scmp.eq.s32.totalorder %s951_s13, 0 }
   0xc   : > { %s967_s18 = scalar_select %p26_p1, %s896_s11, %s28_s16  }
   0xd   : > { %p969_p5 = por %p36_p2, %p35_p0  ;;  %p973_p6 = por %p42_p4, %p41_p3 }
   0xe   : > { %p91_p7 = scmp.eq.s32.totalorder %s951_s13, 3  ;;  %p97_p8 = scmp.eq.s32.totalorder %s662_s14, 3 }
   0xf   : > { %s1160_s20 = scalar_select %p973_p6, 1, 0 }
  0x10   : > { %p732_p9 = scmp.lt.s32.totalorder %s900_s12, 4  ;;  %p979_p10 = por %p91_p7, %p35_p0 }
  0x11   : > { %p983_p11 = por %p97_p8, %p41_p3  ;;  %s988_s23 = sand.u32 1, %s896_s11  }
  0x12   : > { %s1161_s21 = scalar_select %p979_p10, 1, 0 }
  0x13   : > { %s1162_s22 = scalar_select %p983_p11, 1, 0 }
  0x14   : > { %s684_s24 = sshll.u32 %s900_s12, 8  ;;  %s665_s25 = sshll.u32 %s988_s23, 4 }
  0x15   : > { %s995_s28 = scalar_lea.hbm %s1154_s0, %s684_s24  ;;  %s121_s29 = scalar_lea.vmem [#allocation2], %s665_s25 }
  0x16   : > { %s128_s30 = sshll.u32 %s121_s29, 4  ;;  %p999_p12 = pnand %p732_p9, %p969_p5  ;;  %s1003_s30 = int_to_ptr.vmem [resolvable:$true] %s128_s30 }
  0x17   : > { %s118_s4 = scalar_lea.sflag [#allocation3], %s988_s23  ;;  %s776_s5 = scalar_lea.hbm %s995_s28, 256 }
  0x18   : > { %p777_p13 = scmp.ne.s32.totalorder %s995_s28, %s776_s5  ;;  %p778_p0 = pneg %p999_p12 }
  0x19   : > { %s781_s8 = scalar_lea.hbm %s1154_s0, 1024  ;;  %p782_p3 = scmp.lt.s32.totalorder %s995_s28, %s1154_s0 }
  0x1a   : > { %p779_p1 = pnand %p778_p0, %p777_p13  ;;  %p783_p4 = scmp.lt.s32.totalorder %s781_s8, %s776_s5 }
  0x1c   : > { %p780_p2 = pneg %p779_p1  ;;  %p784_p5 = por %p783_p4, %p782_p3 }
  0x1e   : > { %p785_p7 = pnand %p784_p5, %p780_p2 }
  0x20   : > { %788 = shalt.err (!%p785_p7)
}
  0x21   : > { %s789_s17 = scalar_lea.vmem %s1003_s30, 256  ;;  %s902_s19 = smov [#allocation2]  }
  0x22   : > { %p790_p8 = scmp.ne.s32.totalorder %s1003_s30, %s789_s17  ;;  %s794_s24 = sshll.u32 %s902_s19, 4  ;;  %s795_s24 = int_to_ptr.vmem [resolvable:$false] %s794_s24 }
  0x23   : > { %s796_s25 = scalar_lea.vmem %s795_s24, 512  ;;  %p797_p1 = scmp.lt.s32.totalorder %s1003_s30, %s795_s24 }
  0x24   : > { %p792_p9 = pnand %p790_p8, %p778_p0  ;;  %p798_p11 = scmp.lt.s32.totalorder %s796_s25, %s789_s17 }
  0x26   : > { %p793_p13 = pneg %p792_p9  ;;  %p799_p10 = por %p798_p11, %p797_p1 }
  0x28   : > { %p800_p3 = pnand %p799_p10, %p793_p13 }
  0x2a   : > { %803 = shalt.err (!%p800_p3)
}
  0x2b   : > { %s903_s26 = smov 64   ;;  %s904_s27 = smov 4  }
  0x2c   : > { %724 = dma.hbm_to_vmem [thread:$0]  (!%p999_p12), %s995_s28, 256, %s1003_s30, %s118_s4, %s903_s26, %s903_s26, %s904_s27  }
  0x2d   : > { %p671_p2 = scmp.ge.s32.totalorder %s900_s12, 1  ;;  %p157_p4 = scmp.lt.s32.totalorder %s900_s12, 5 }
  0x2e   : > { %s668_s29 = sshll.u32 %s988_s23, 5  ;;  %s685_s6 = sshll.u32 %s900_s12, 9 }
  0x2f   : > { %p1035_p10 = pnand %p671_p2, %p157_p4  ;;  %s142_s7 = scalar_lea.vmem [#allocation5], %s668_s29 }
  0x30   : > { %s149_s8 = sshll.u32 %s142_s7, 4  ;;  %s1043_s17 = scalar_lea.hbm %s1155_s1, %s685_s6  ;;  %s1045_s8 = int_to_ptr.vmem [resolvable:$true] %s149_s8 }
  0x31   : > { %s139_s28 = scalar_lea.sflag [#allocation6], %s988_s23  ;;  %s804_s30 = scalar_lea.hbm %s1043_s17, 512 }
  0x32   : > { %p805_p11 = scmp.ne.s32.totalorder %s1043_s17, %s804_s30  ;;  %s809_s24 = scalar_lea.hbm %s1155_s1, 2048 }
  0x33   : > { %p810_p8 = scmp.lt.s32.totalorder %s1043_s17, %s1155_s1  ;;  %p811_p9 = scmp.lt.s32.totalorder %s809_s24, %s804_s30 }
  0x34   : > { %p807_p5 = pnand %p805_p11, %p778_p0 }
  0x35   : > { %p812_p13 = por %p811_p9, %p810_p8 }
  0x36   : > { %p808_p7 = pneg %p807_p5 }
  0x38   : > { %p813_p1 = pnand %p812_p13, %p808_p7 }
  0x3a   : > { %816 = shalt.err (!%p813_p1)
}
  0x3b   : > { %s817_s27 = scalar_lea.vmem %s1045_s8, 512  ;;  %s905_s29 = smov [#allocation5]  }
  0x3c   : > { %p818_p3 = scmp.ne.s32.totalorder %s1045_s8, %s817_s27  ;;  %s822_s6 = sshll.u32 %s905_s29, 4  ;;  %s823_s6 = int_to_ptr.vmem [resolvable:$false] %s822_s6 }
  0x3d   : > { %s824_s7 = scalar_lea.vmem %s823_s6, 1024  ;;  %p825_p11 = scmp.lt.s32.totalorder %s1045_s8, %s823_s6 }
  0x3e   : > { %p820_p2 = pnand %p818_p3, %p778_p0  ;;  %p826_p5 = scmp.lt.s32.totalorder %s824_s7, %s817_s27 }
  0x40   : > { %p821_p4 = pneg %p820_p2  ;;  %p827_p6 = por %p826_p5, %p825_p11 }
  0x42   : > { %p828_p8 = pnand %p827_p6, %p821_p4 }
  0x44   : > { %831 = shalt.err (!%p828_p8)
}
  0x45   : > { %s906_s14 = smov 128   ;;  %s907_s16 = smov 8  }
  0x46   : > { %727 = dma.hbm_to_vmem [thread:$0]  (!%p999_p12), %s1043_s17, 512, %s1045_s8, %s139_s28, %s906_s14, %s906_s14, %s907_s16  }
  0x47   : > { %161 = sbr.rel (%p1035_p10) target bundleno = 423 (0x1a7), region = 28  ;;  %s1075_s30 = sand.u32 (!%p1035_p10), 1, %s892_s10  }
  0x48   : > { %s672_s4 = sshll.u32 (!%p1035_p10), %s1075_s30, 4  ;;  %s164_s19 = scalar_lea.sflag (!%p1035_p10), [#allocation3], %s1075_s30 }
  0x49   : > { %s167_s24 = scalar_lea.vmem (!%p1035_p10), [#allocation2], %s672_s4  ;;  %p1165_p6 = scmp.ne.s32.totalorder (!%p1035_p10), %s1160_s20, 0 }
  0x4c   : > { %875 = dma.done.wait (%p1165_p6), %s164_s19, 256  }
  0x4d   : > { %877 = vsyncadd (%p1165_p6), %s164_s19, 4294967040  ;;  %s673_s23 = sshll.u32 %s1075_s30, 5  ;;  %s173_s3 = scalar_lea.sflag [#allocation6], %s1075_s30 }
  0x4e   : > { %s176_s5 = scalar_lea.vmem [#allocation5], %s673_s23 }
  0x4f   : > { %879 = dma.done.wait (%p1165_p6), %s173_s3, 512  }
  0x50   : > { %881 = vsyncadd (%p1165_p6), %s173_s3, 4294966784  ;;  %v908_v0 = vmov 0.0   ;;  %vm909_vm0 = vmmov 0   ;;  %vm210_vm1 = vcmask 64512   ;;  %v206_v1 = vld [vmem:[%s176_s5] sm:$0xff]  ;;  %v207_v2 = vld [vmem:[%s176_s5 + $0x8] sm:$0xff] }
  0x51   : > { %695 = vmatprep.subr.mxu0 %v908_v0  ;;  %700 = vmatprep.subr.mxu1 %v908_v0  ;;  %v202_v3 = vld [vmem:[%s167_s24] sm:$0xf]  ;;  %v203_v4 = vld [vmem:[%s167_s24 + $0x4] sm:$0xf]  ;;  %v209_v6 = vld [vmem:[%s176_s5 + $0x18] sm:$0xff]  ;;  %s910_s20 = smov 8  }
  0x52   : > { %697 = vmatprep.mubr.msk.f32.mxu0 %vm909_vm0, %v908_v0  ;;  %702 = vmatprep.mubr.msk.f32.mxu1 %vm909_vm0, %v908_v0  ;;  %v208_v5 = vld [vmem:[%s176_s5 + $0x10] sm:$0xff]  ;;  %v204_v7 = vld [vmem:[%s167_s24 + $0x8] sm:$0xf]  ;;  %v205_v8 = vld [vmem:[%s167_s24 + $0xc] sm:$0xf]  ;;  %s911_s8 = smov 120  }
  0x53   : > { %696 = vmatpush3.msra.mxu0 %v206_v1  ;;  %701 = vmatpush3.msra.mxu1 %v207_v2  ;;  %s674_s17 = sshll.u32 %s1075_s30, 3  ;;  %vm547_vm2 = vcmask 123904   ;;  %s686_s26 = sshll.u32 %s951_s13, 7 }
  0x54   : > { %698 = vmatmul.mubr.msk.f32.vlgmr.msra.gmra.mxu0 %vm210_vm1, %v202_v3  ;;  %703 = vmatmul.mubr.msk.f32.vlgmr.msra.gmra.mxu1 %vm210_vm1, %v203_v4  ;;  %s201_s28 = scalar_lea.vmem [#allocation7], %s674_s17  ;;  %s1108_s13 = scalar_lea.hbm %s1156_s2, %s686_s26 }
  0x55   : > { %705 = vmatprep.subr.mxu0 %v908_v0  ;;  %707 = vmatprep.mubr.msk.f32.mxu0 %vm909_vm0, %v908_v0  ;;  %s566_s25 = sshll.u32 %s201_s28, 4  ;;  %s553_s6 = scalar_lea.sflag [#allocation4], %s1075_s30  ;;  %s1102_s25 = int_to_ptr.vmem [resolvable:$true] %s566_s25 }
  0x56   : > { %706 = vmatpush3.msra.mxu0 %v208_v5  ;;  %710 = vmatprep.subr.mxu1 %v908_v0  ;;  %s832_s7 = scalar_lea.vmem %s1102_s25, 128  ;;  %p1166_p0 = scmp.ne.s32.totalorder %s1161_s21, 0 }
  0x57   : > { %711 = vmatpush3.msra.mxu1 %v209_v6  ;;  %712 = vmatprep.mubr.msk.f32.mxu1 %vm909_vm0, %v908_v0  ;;  %p833_p12 = scmp.ne.s32.totalorder %s1102_s25, %s832_s7  ;;  %s912_s14 = smov [#allocation7]  }
  0x58   : > { %708 = vmatmul.mubr.msk.f32.vlgmr.msra.gmra.mxu0 %vm210_vm1, %v204_v7  ;;  %713 = vmatmul.mubr.msk.f32.vlgmr.msra.gmra.mxu1 %vm210_vm1, %v205_v8  ;;  %s836_s16 = sshll.u32 %s912_s14, 4  ;;  %s837_s16 = int_to_ptr.vmem [resolvable:$false] %s836_s16 }
  0x59   : > { %p834_p10 = pnand %p833_p12, %p1166_p0  ;;  %s838_s4 = scalar_lea.vmem %s837_s16, 256 }
  0x5a   : > { %p839_p9 = scmp.lt.s32.totalorder %s1102_s25, %s837_s16  ;;  %p840_p13 = scmp.lt.s32.totalorder %s838_s4, %s832_s7 }
  0x5b   : > { %p835_p7 = pneg %p834_p10 }
  0x5c   : > { %p841_p1 = por %p840_p13, %p839_p9 }
  0x5e   : > { %p842_p3 = pnand %p841_p1, %p835_p7 }
 0x114   : > { %v280_v9 = vpop.f32.mrf.mxu0  ;;  %v353_v10 = vpop.f32.mrf.mxu1 }
 0x115   : > { %v508_v11 = vrot.slane %v353_v10, 2  ;;  %v507_v12 = vrot.slane %v280_v9, 2 }
 0x116   : > { %v699_v13 = vpop.f32.mrf.mxu0  ;;  %v704_v14 = vpop.f32.mrf.mxu1 }
 0x117   : > { %529 = vrot.lane.b32.xlu1 %v508_v11, %s910_s20  ;;  %511 = vrot.lane.b32.xlu0 %v507_v12, %s911_s8 }
 0x118   : > { %v426_v15 = vpop.f32.mrf.mxu0  ;;  %v499_v16 = vpop.f32.mrf.mxu1 }
 0x119   : > { %v509_v17 = vrot.slane %v426_v15, 2  ;;  %v510_v20 = vrot.slane %v499_v16, 2 }
 0x11a   : > { %v709_v18 = vpop.f32.mrf.mxu0  ;;  %v714_v19 = vpop.f32.mrf.mxu1 }
 0x11b   : > { %513 = vrot.lane.b32.xlu0 %v508_v11, %s911_s8  ;;  %515 = vrot.lane.b32.xlu1 %v509_v17, %s911_s8 }
 0x11f   : > { %527 = vrot.lane.b32.xlu0 %v507_v12, %s910_s20  ;;  %517 = vrot.lane.b32.xlu1 %v510_v20, %s911_s8 }
 0x123   : > { %531 = vrot.lane.b32.xlu0 %v509_v17, %s910_s20  ;;  %533 = vrot.lane.b32.xlu1 %v510_v20, %s910_s20 }
 0x189   : > { %v530_v21 = vpop.permute.xlu1 %529  ;;  %v512_v22 = vpop.permute.xlu0 %511 }
 0x18a   : > { %v540_v25 = vadd.f32 %v530_v21, %v353_v10  ;;  %v523_v30 = vsub.f32 %v280_v9, %v512_v22 }
 0x18d   : > { %v514_v23 = vpop.permute.xlu0 %513  ;;  %v516_v24 = vpop.permute.xlu1 %515 }
 0x18e   : > { %v524_v26 = vsub.f32 %v353_v10, %v514_v23  ;;  %v525_v35 = vsub.f32 %v426_v15, %v516_v24 }
 0x190   : > { %v544_v27 = vsel %vm210_vm1, %v524_v26, %v540_v25 }
 0x191   : > { %549 = vst.msk [vmem:[%s201_s28 + $0x2] sm:$0x3] %vm547_vm2, %v544_v27  ;;  %v528_v28 = vpop.permute.xlu0 %527  ;;  %v518_v29 = vpop.permute.xlu1 %517 }
 0x192   : > { %v539_v31 = vadd.f32 %v528_v28, %v280_v9  ;;  %v526_v36 = vsub.f32 %v499_v16, %v518_v29 }
 0x194   : > { %v543_v32 = vsel %vm210_vm1, %v523_v30, %v539_v31 }
 0x195   : > { %548 = vst.msk [vmem:[%s201_s28] sm:$0x3] %vm547_vm2, %v543_v32  ;;  %v532_v33 = vpop.permute.xlu0 %531  ;;  %v534_v34 = vpop.permute.xlu1 %533 }
 0x196   : > { %v541_v37 = vadd.f32 %v532_v33, %v426_v15  ;;  %v542_v38 = vadd.f32 %v534_v34, %v499_v16 }
 0x198   : > { %v545_v39 = vsel %vm210_vm1, %v525_v35, %v541_v37  ;;  %v546_v40 = vsel %vm210_vm1, %v526_v36, %v542_v38 }
 0x199   : > { %550 = vst.msk [vmem:[%s201_s28 + $0x4] sm:$0x3] %vm547_vm2, %v545_v39  ;;  %551 = vst.msk [vmem:[%s201_s28 + $0x6] sm:$0x3] %vm547_vm2, %v546_v40 }
 0x19a   : > { %845 = shalt.err (!%p842_p3)
}
 0x19b   : > { %s846_s19 = scalar_lea.hbm %s1108_s13, 128  ;;  %s850_s3 = scalar_lea.hbm %s1156_s2, 512 }
 0x19c   : > { %p847_p2 = scmp.ne.s32.totalorder %s1108_s13, %s846_s19  ;;  %p851_p5 = scmp.lt.s32.totalorder %s1108_s13, %s1156_s2 }
 0x19d   : > { %p852_p8 = scmp.lt.s32.totalorder %s850_s3, %s846_s19 }
 0x19e   : > { %p848_p4 = pnand %p847_p2, %p1166_p0 }
 0x19f   : > { %p853_p6 = por %p852_p8, %p851_p5 }
 0x1a0   : > { %p849_p11 = pneg %p848_p4 }
 0x1a2   : > { %p854_p12 = pnand %p853_p6, %p849_p11 }
 0x1a4   : > { %857 = shalt.err (!%p854_p12)
}
 0x1a5   : > { %s913_s8 = smov 32   ;;  %s914_s17 = smov 2  }
 0x1a6   : > { %719 = dma.vmem_to_hbm [thread:$0]  (%p1166_p0), %s1102_s25, 128, %s1108_s13, %s553_s6, %s913_s8, %s913_s8, %s914_s17  }
 0x1a7 PF: > { %p733_p10 = scmp.ge.s32.totalorder %s900_s12, 2  ;;  %s581_s28 = sand.u32 1, %s888_s9  }
 0x1a8   : > { %p1167_p7 = scmp.ne.s32.totalorder %s1162_s22, 0  ;;  %s582_s26 = scalar_lea.sflag [#allocation4], %s581_s28 }
 0x1aa   : > { %p729_p9 = pnand %p733_p10, %p1167_p7 }
 0x1ac   : > { %p730_p13 = pneg %p729_p9 }
 0x1ae   : > { %883 = dma.done.wait (%p730_p13), %s582_s26, 128  }
 0x1af   : > { %885 = vsyncadd (%p730_p13), %s582_s26, 4294967168  ;;  %p18_p1 = scmp.ge.s32.totalorder %s955_s15, 6   ;;  %s1168_s9 = smov %s892_s10 }
 0x1b0   : > { %s1169_s10 = smov %s896_s11  ;;  %s1170_s11 = smov %s967_s18 }
 0x1b1   : > { %s1171_s12 = smov %s955_s15  ;;  %20 = sbr.rel (!%p18_p1) target bundleno = 7 (0x7), region = 86 }
 0x1b6   :  { %587 = vsyncpa [#allocation3], 1 }
 0x1b7   :  { %589 = vsyncpa [#allocation3 + $0x1], 1 }
 0x1b8   :  { %590 = vsyncpa [#allocation6], 1 }
 0x1b9   :  { %592 = vsyncpa [#allocation6 + $0x1], 1 }
 0x1ba   :  { %593 = vsyncpa [#allocation4], 1 }
 0x1bb   :  { %595 = vsyncpa [#allocation4 + $0x1], 1 }

</bundles_post_ra>
